<compile_context>
chip_gen: v6e
topology: v6e:2x2x1
jax: 0.10.0
libtpu: 0.0.40
codegen_flags: <defaults>
</compile_context>

<pallas_src>
import math
from functools import partial

import jax
import jax.numpy as jnp
from jax.experimental import pallas as pl
from jax.experimental.pallas import tpu as pltpu


def actor_critic_kernel(
    state_ref, action_ref, inv_var_ref, const_ref,
    w1_ref, b1_ref, w2_ref, b2_ref, w3_ref, b3_ref,
    out_ref,
):
    """One batch tile: fused actor+critic MLP + diag-Gaussian log_prob."""
    x = state_ref[...]                                   # (TB, S)

    # Fused layer 1: actor|critic side-by-side -> lane-dense (TB, 128).
    h1 = jnp.tanh(
        jnp.dot(x, w1_ref[...], preferred_element_type=jnp.float32)
        + b1_ref[...])
    # Fused layer 2 (block-diagonal weights): (TB, 64) = [actor32 | critic32].
    h2 = jnp.tanh(
        jnp.dot(h1, w2_ref[...], preferred_element_type=jnp.float32)
        + b2_ref[...])
    # Fused layer 3 (block-diagonal): (TB, A+1) = [actor_mean_pre | value].
    z = (jnp.dot(h2, w3_ref[...], preferred_element_type=jnp.float32)
         + b3_ref[...])

    a_dim = action_ref.shape[-1]
    mean = jnp.tanh(z[:, :a_dim])                        # (TB, A)
    value = z[:, a_dim:a_dim + 1]                        # (TB, 1) (no tanh)

    # Diag-covariance MultivariateNormal log_prob:
    #   -0.5 * sum(diff^2 / var) - 0.5*log|Sigma| - 0.5*A*log(2*pi)
    # constant part (const_ref) precomputed host-side; 1/var passed in.
    diff = action_ref[...] - mean
    quad = jnp.sum(diff * diff * inv_var_ref[...], axis=-1, keepdims=True)
    logp = -0.5 * quad - const_ref[0, 0]                 # (TB, 1)

    out_ref[...] = jnp.concatenate([logp, value], axis=-1)   # (TB, 2)


def _fuse_params(params, action_dim):
    """Pack actor+critic weights: concat layer 1, block-diagonal layers 2/3."""
    f32 = jnp.float32
    w1 = jnp.concatenate([params["aw1"], params["cw1"]], axis=1)      # (S,128)
    b1 = jnp.concatenate([params["ab1"], params["cb1"]], axis=1)      # (1,128)
    z64x32 = jnp.zeros((64, 32), f32)
    w2 = jnp.concatenate(
        [jnp.concatenate([params["aw2"], z64x32], axis=1),
         jnp.concatenate([z64x32, params["cw2"]], axis=1)], axis=0)   # (128,64)
    b2 = jnp.concatenate([params["ab2"], params["cb2"]], axis=1)      # (1,64)
    w3 = jnp.concatenate(
        [jnp.concatenate([params["aw3"], jnp.zeros((32, 1), f32)], axis=1),
         jnp.concatenate([jnp.zeros((32, action_dim), f32), params["cw3"]],
                         axis=1)], axis=0)                            # (64,A+1)
    b3 = jnp.concatenate([params["ab3"], params["cb3"]], axis=1)      # (1,A+1)
    return w1, b1, w2, b2, w3, b3


@partial(jax.jit, static_argnames=("tile_b",))
def actor_critic_evaluate(state, action, action_var, params, tile_b=128):
    """Returns (action_logprobs [B], state_value [B], dist_entropy [B])."""
    B, S = state.shape
    A = action.shape[-1]
    log2pi = math.log(2.0 * math.pi)

    # Per-call constants: computed once in the wrapper, not per grid step.
    logdet = jnp.sum(jnp.log(action_var))
    inv_var = (1.0 / action_var).reshape(1, A).astype(jnp.float32)
    logp_const = (0.5 * logdet + 0.5 * A * log2pi).reshape(1, 1).astype(jnp.float32)
    entropy = 0.5 * A * (1.0 + log2pi) + 0.5 * logdet      # scalar, constant

    w1, b1, w2, b2, w3, b3 = _fuse_params(params, A)

    # Pad batch to a multiple of the batch tile (padded rows are sliced off).
    n_tiles = pl.cdiv(B, tile_b)
    b_pad = n_tiles * tile_b
    if b_pad != B:
        state = jnp.pad(state, ((0, b_pad - B), (0, 0)))
        action = jnp.pad(action, ((0, b_pad - B), (0, 0)))

    rep = lambda i: (0, 0)   # tiny weights / constants: same block every step
    out = pl.pallas_call(
        actor_critic_kernel,
        out_shape=jax.ShapeDtypeStruct((b_pad, 2), jnp.float32),
        grid=(n_tiles,),
        in_specs=[
            pl.BlockSpec((tile_b, S), lambda i: (i, 0)),     # state
            pl.BlockSpec((tile_b, A), lambda i: (i, 0)),     # action
            pl.BlockSpec((1, A), rep),                       # inv_var
            pl.BlockSpec(memory_space=pltpu.MemorySpace.SMEM),  # logp const
            pl.BlockSpec((S, 128), rep),                     # fused W1
            pl.BlockSpec((1, 128), rep),                     # fused b1
            pl.BlockSpec((128, 64), rep),                    # fused W2
            pl.BlockSpec((1, 64), rep),                      # fused b2
            pl.BlockSpec((64, A + 1), rep),                  # fused W3
            pl.BlockSpec((1, A + 1), rep),                   # fused b3
        ],
        out_specs=pl.BlockSpec((tile_b, 2), lambda i: (i, 0)),
        compiler_params=pltpu.CompilerParams(
            dimension_semantics=("parallel",),
            vmem_limit_bytes=32 * 1024 * 1024,
        ),
    )(state, action, inv_var, logp_const, w1, b1, w2, b2, w3, b3)

    logp = out[:B, 0]
    value = out[:B, 1]
    ent = jnp.full((B,), entropy, jnp.float32)
    return logp, value, ent


def init_params(key, state_dim, action_dim):
    """Deterministic synthetic parameters matching nn.Linear shapes,
    stored transposed as [in, out]."""
    dims_actor = [(state_dim, 64), (64, 32), (32, action_dim)]
    dims_critic = [(state_dim, 64), (64, 32), (32, 1)]
    params = {}
    names = [("aw1", "ab1"), ("aw2", "ab2"), ("aw3", "ab3"),
             ("cw1", "cb1"), ("cw2", "cb2"), ("cw3", "cb3")]
    for (wname, bname), (fin, fout) in zip(names, dims_actor + dims_critic):
        key, kw, kb = jax.random.split(key, 3)
        bound = 1.0 / math.sqrt(fin)
        params[wname] = jax.random.uniform(
            kw, (fin, fout), jnp.float32, -bound, bound)
        params[bname] = jax.random.uniform(
            kb, (1, fout), jnp.float32, -bound, bound)
    return params


def reference_evaluate(state, action, action_var, params):
    """Pure-JAX reference mirroring the PyTorch `evaluate` (Gaussian)."""
    h = jnp.tanh(state @ params["aw1"] + params["ab1"])
    h = jnp.tanh(h @ params["aw2"] + params["ab2"])
    mean = jnp.tanh(h @ params["aw3"] + params["ab3"])
    a_dim = mean.shape[-1]
    diff = action - mean
    logdet = jnp.sum(jnp.log(action_var))
    logp = (-0.5 * jnp.sum(diff * diff / action_var[None, :], axis=-1)
            - 0.5 * logdet - 0.5 * a_dim * math.log(2.0 * math.pi))
    ent = 0.5 * a_dim * (1.0 + math.log(2.0 * math.pi)) + 0.5 * logdet
    ent = jnp.full((state.shape[0],), ent, jnp.float32)
    v = jnp.tanh(state @ params["cw1"] + params["cb1"])
    v = jnp.tanh(v @ params["cw2"] + params["cb2"])
    value = (v @ params["cw3"] + params["cb3"])[:, 0]
    return logp, value, ent


if __name__ == "__main__":
    state_dim, action_dim, batch = 16, 4, 24
    action_std = 0.5

    key = jax.random.PRNGKey(0)
    key, ks, ka = jax.random.split(key, 3)
    state = jax.random.normal(ks, (batch, state_dim), jnp.float32)
    action = jax.random.normal(ka, (batch, action_dim), jnp.float32)
    action_var = jnp.full((action_dim,), action_std * action_std, jnp.float32)
    params = init_params(key, state_dim, action_dim)

    # tile_b=8 keeps shapes small while exercising a multi-step batch grid;
    # production PPO buffers should use tile_b ~ 512-2048.
    logp, value, ent = actor_critic_evaluate(
        state, action, action_var, params, tile_b=8)
    jax.block_until_ready((logp, value, ent))

    r_logp, r_value, r_ent = reference_evaluate(state, action, action_var, params)
    assert jnp.allclose(logp, r_logp, atol=1e-4, rtol=1e-4)
    assert jnp.allclose(value, r_value, atol=1e-4, rtol=1e-4)
    assert jnp.allclose(ent, r_ent, atol=1e-4, rtol=1e-4)

    # TODO(synk): the `act` path's dist.sample() (RNG sampling) is not
    # implemented in-kernel; only the deterministic `evaluate` math is fused.
    print("KERNEL_OK")
</pallas_src>

<mosaic_0001>
module attributes {stable_mosaic.version = 11 : i64} {
  func.func @actor_critic_kernel(%arg0: i32, %arg1: memref<8x16xf32, #tpu.memory_space<vmem>>, %arg2: memref<8x4xf32, #tpu.memory_space<vmem>>, %arg3: memref<1x4xf32, #tpu.memory_space<vmem>>, %arg4: memref<1x1xf32, #tpu.memory_space<smem>>, %arg5: memref<16x128xf32, #tpu.memory_space<vmem>>, %arg6: memref<1x128xf32, #tpu.memory_space<vmem>>, %arg7: memref<128x64xf32, #tpu.memory_space<vmem>>, %arg8: memref<1x64xf32, #tpu.memory_space<vmem>>, %arg9: memref<64x5xf32, #tpu.memory_space<vmem>>, %arg10: memref<1x5xf32, #tpu.memory_space<vmem>>, %arg11: memref<8x2xf32, #tpu.memory_space<vmem>>) attributes {dimension_semantics = [#tpu.dimension_semantics<parallel>], iteration_bounds = array<i64: 3>, scalar_prefetch = 0 : i64, scratch_operands = 0 : i64, tpu.core_type = #tpu.core_type<tc>, window_params = [{transform_indices = @transform_0, window_bounds = array<i64: 8, 16>}, {transform_indices = @transform_1, window_bounds = array<i64: 8, 4>}, {pipeline_mode = #tpu.pipeline_mode<synchronous>, transform_indices = @transform_2, window_bounds = array<i64: 1, 4>}, {transform_indices = @transform_3, window_bounds = array<i64: 1, 1>}, {pipeline_mode = #tpu.pipeline_mode<synchronous>, transform_indices = @transform_4, window_bounds = array<i64: 16, 128>}, {pipeline_mode = #tpu.pipeline_mode<synchronous>, transform_indices = @transform_5, window_bounds = array<i64: 1, 128>}, {pipeline_mode = #tpu.pipeline_mode<synchronous>, transform_indices = @transform_6, window_bounds = array<i64: 128, 64>}, {pipeline_mode = #tpu.pipeline_mode<synchronous>, transform_indices = @transform_7, window_bounds = array<i64: 1, 64>}, {pipeline_mode = #tpu.pipeline_mode<synchronous>, transform_indices = @transform_8, window_bounds = array<i64: 64, 5>}, {pipeline_mode = #tpu.pipeline_mode<synchronous>, transform_indices = @transform_9, window_bounds = array<i64: 1, 5>}, {transform_indices = @transform_10, window_bounds = array<i64: 8, 2>}]} {
    %c0 = arith.constant 0 : index
    %c0_0 = arith.constant 0 : index
    %0 = vector.load %arg1[%c0, %c0_0] : memref<8x16xf32, #tpu.memory_space<vmem>>, vector<8x16xf32>
    %c0_1 = arith.constant 0 : index
    %c0_2 = arith.constant 0 : index
    %1 = vector.load %arg5[%c0_1, %c0_2] : memref<16x128xf32, #tpu.memory_space<vmem>>, vector<16x128xf32>
    %cst = arith.constant dense<0.000000e+00> : vector<8x128xf32>
    %2 = tpu.matmul %0, %1, %cst {dimension_numbers = #tpu.dot_dimension_numbers<[1], [0], [0], [1], [0, 0, 1, 1], [], []>} : vector<8x16xf32>, vector<16x128xf32>, vector<8x128xf32> -> vector<8x128xf32>
    %c0_3 = arith.constant 0 : index
    %c0_4 = arith.constant 0 : index
    %3 = vector.load %arg6[%c0_3, %c0_4] : memref<1x128xf32, #tpu.memory_space<vmem>>, vector<1x128xf32>
    %4 = vector.broadcast %3 : vector<1x128xf32> to vector<8x128xf32>
    %5 = arith.addf %2, %4 : vector<8x128xf32>
    %6 = math.tanh %5 : vector<8x128xf32>
    %c0_5 = arith.constant 0 : index
    %c0_6 = arith.constant 0 : index
    %7 = vector.load %arg7[%c0_5, %c0_6] : memref<128x64xf32, #tpu.memory_space<vmem>>, vector<128x64xf32>
    %cst_7 = arith.constant dense<0.000000e+00> : vector<8x64xf32>
    %8 = tpu.matmul %6, %7, %cst_7 {dimension_numbers = #tpu.dot_dimension_numbers<[1], [0], [0], [1], [0, 0, 1, 1], [], []>} : vector<8x128xf32>, vector<128x64xf32>, vector<8x64xf32> -> vector<8x64xf32>
    %c0_8 = arith.constant 0 : index
    %c0_9 = arith.constant 0 : index
    %9 = vector.load %arg8[%c0_8, %c0_9] : memref<1x64xf32, #tpu.memory_space<vmem>>, vector<1x64xf32>
    %10 = vector.broadcast %9 : vector<1x64xf32> to vector<8x64xf32>
    %11 = arith.addf %8, %10 : vector<8x64xf32>
    %12 = math.tanh %11 : vector<8x64xf32>
    %c0_10 = arith.constant 0 : index
    %c0_11 = arith.constant 0 : index
    %13 = vector.load %arg9[%c0_10, %c0_11] : memref<64x5xf32, #tpu.memory_space<vmem>>, vector<64x5xf32>
    %cst_12 = arith.constant dense<0.000000e+00> : vector<8x5xf32>
    %14 = tpu.matmul %12, %13, %cst_12 {dimension_numbers = #tpu.dot_dimension_numbers<[1], [0], [0], [1], [0, 0, 1, 1], [], []>} : vector<8x64xf32>, vector<64x5xf32>, vector<8x5xf32> -> vector<8x5xf32>
    %c0_13 = arith.constant 0 : index
    %c0_14 = arith.constant 0 : index
    %15 = vector.load %arg10[%c0_13, %c0_14] : memref<1x5xf32, #tpu.memory_space<vmem>>, vector<1x5xf32>
    %16 = vector.broadcast %15 : vector<1x5xf32> to vector<8x5xf32>
    %17 = arith.addf %14, %16 : vector<8x5xf32>
    %18 = vector.extract_strided_slice %17 {offsets = [0, 0], sizes = [8, 4], strides = [1, 1]} : vector<8x5xf32> to vector<8x4xf32>
    %19 = math.tanh %18 : vector<8x4xf32>
    %20 = vector.extract_strided_slice %17 {offsets = [0, 4], sizes = [8, 1], strides = [1, 1]} : vector<8x5xf32> to vector<8x1xf32>
    %c0_15 = arith.constant 0 : index
    %c0_16 = arith.constant 0 : index
    %21 = vector.load %arg2[%c0_15, %c0_16] : memref<8x4xf32, #tpu.memory_space<vmem>>, vector<8x4xf32>
    %22 = arith.subf %21, %19 : vector<8x4xf32>
    %23 = arith.mulf %22, %22 : vector<8x4xf32>
    %c0_17 = arith.constant 0 : index
    %c0_18 = arith.constant 0 : index
    %24 = vector.load %arg3[%c0_17, %c0_18] : memref<1x4xf32, #tpu.memory_space<vmem>>, vector<1x4xf32>
    %25 = vector.broadcast %24 : vector<1x4xf32> to vector<8x4xf32>
    %26 = arith.mulf %23, %25 : vector<8x4xf32>
    %cst_19 = arith.constant dense<0.000000e+00> : vector<8xf32>
    %27 = vector.multi_reduction <add>, %26, %cst_19 [1] : vector<8x4xf32> to vector<8xf32>
    %28 = vector.shape_cast %27 : vector<8xf32> to vector<8x1xf32>
    %cst_20 = arith.constant -5.000000e-01 : f32
    %29 = vector.broadcast %cst_20 : f32 to vector<8x1xf32>
    %30 = arith.mulf %29, %28 : vector<8x1xf32>
    %c0_21 = arith.constant 0 : index
    %c0_22 = arith.constant 0 : index
    %31 = memref.load %arg4[%c0_21, %c0_22] : memref<1x1xf32, #tpu.memory_space<smem>>
    %32 = vector.broadcast %31 : f32 to vector<8x1xf32>
    %33 = arith.subf %30, %32 : vector<8x1xf32>
    %34 = tpu.concatenate %33, %20 in 1 : vector<8x1xf32>, vector<8x1xf32> -> vector<8x2xf32>
    %c0_23 = arith.constant 0 : index
    %c0_24 = arith.constant 0 : index
    %35 = vector.load %arg11[%c0_23, %c0_24] : memref<8x2xf32, #tpu.memory_space<vmem>>, vector<8x2xf32>
    tpu.vector_store %arg11[%c0_23, %c0_24], %34 {strides = array<i32>} : memref<8x2xf32, #tpu.memory_space<vmem>>, vector<8x2xf32>,
    return
  }
  func.func @transform_0(%arg0: i32) -> (i32, i32) {
    %c0_i32 = arith.constant 0 : i32
    %c0_i32_0 = arith.constant 0 : i32
    return %arg0, %c0_i32 : i32, i32
  }
  func.func @transform_1(%arg0: i32) -> (i32, i32) {
    %c0_i32 = arith.constant 0 : i32
    %c0_i32_0 = arith.constant 0 : i32
    return %arg0, %c0_i32 : i32, i32
  }
  func.func @transform_2(%arg0: i32) -> (i32, i32) {
    %c0_i32 = arith.constant 0 : i32
    %c0_i32_0 = arith.constant 0 : i32
    %c0_i32_1 = arith.constant 0 : i32
    return %c0_i32, %c0_i32_0 : i32, i32
  }
  func.func @transform_3(%arg0: i32) -> (i32, i32) {
    %c0_i32 = arith.constant 0 : i32
    %c0_i32_0 = arith.constant 0 : i32
    %c0_i32_1 = arith.constant 0 : i32
    return %c0_i32, %c0_i32_0 : i32, i32
  }
  func.func @transform_4(%arg0: i32) -> (i32, i32) {
    %c0_i32 = arith.constant 0 : i32
    %c0_i32_0 = arith.constant 0 : i32
    %c0_i32_1 = arith.constant 0 : i32
    return %c0_i32, %c0_i32_0 : i32, i32
  }
  func.func @transform_5(%arg0: i32) -> (i32, i32) {
    %c0_i32 = arith.constant 0 : i32
    %c0_i32_0 = arith.constant 0 : i32
    %c0_i32_1 = arith.constant 0 : i32
    return %c0_i32, %c0_i32_0 : i32, i32
  }
  func.func @transform_6(%arg0: i32) -> (i32, i32) {
    %c0_i32 = arith.constant 0 : i32
    %c0_i32_0 = arith.constant 0 : i32
    %c0_i32_1 = arith.constant 0 : i32
    return %c0_i32, %c0_i32_0 : i32, i32
  }
  func.func @transform_7(%arg0: i32) -> (i32, i32) {
    %c0_i32 = arith.constant 0 : i32
    %c0_i32_0 = arith.constant 0 : i32
    %c0_i32_1 = arith.constant 0 : i32
    return %c0_i32, %c0_i32_0 : i32, i32
  }
  func.func @transform_8(%arg0: i32) -> (i32, i32) {
    %c0_i32 = arith.constant 0 : i32
    %c0_i32_0 = arith.constant 0 : i32
    %c0_i32_1 = arith.constant 0 : i32
    return %c0_i32, %c0_i32_0 : i32, i32
  }
  func.func @transform_9(%arg0: i32) -> (i32, i32) {
    %c0_i32 = arith.constant 0 : i32
    %c0_i32_0 = arith.constant 0 : i32
    %c0_i32_1 = arith.constant 0 : i32
    return %c0_i32, %c0_i32_0 : i32, i32
  }
  func.func @transform_10(%arg0: i32) -> (i32, i32) {
    %c0_i32 = arith.constant 0 : i32
    %c0_i32_0 = arith.constant 0 : i32
    return %arg0, %c0_i32 : i32, i32
  }
}

</mosaic_0001>

<bundles_post_ra>
// kernel: actor_critic_evaluate.1
= control target key start
LH: loop header
LB: loop body
LE: loop exit
PB: predicated region body
PF: predicated region fallthrough
CT: control target
= control target key end

     0   :  { %s926_s15 = smov 0   ;;  %s1073_s0 = inlined_call_operand.vmem [shape: f32[24,16], index: 0, kind: input, shape index: {}]   ;;  %s1074_s1 = inlined_call_operand.vmem [shape: f32[24,4], index: 1, kind: input, shape index: {}]   ;;  %s1075_s2 = inlined_call_operand.vmem [shape: f32[1,4], index: 2, kind: input, shape index: {}]   ;;  %s1076_s3 = inlined_call_operand.<no memory space> [shape: f32[1,1], index: 3, kind: input, shape index: {}]   ;;  %s1077_s4 = inlined_call_operand.vmem [shape: f32[16,128], index: 4, kind: input, shape index: {}]   ;;  %s1078_s5 = inlined_call_operand.vmem [shape: f32[1,128], index: 5, kind: input, shape index: {}]   ;;  %s1079_s6 = inlined_call_operand.vmem [shape: f32[128,64], index: 6, kind: input, shape index: {}]   ;;  %s1080_s7 = inlined_call_operand.vmem [shape: f32[1,64], index: 7, kind: input, shape index: {}]   ;;  %s1081_s8 = inlined_call_operand.vmem [shape: f32[64,5], index: 8, kind: input, shape index: {}]   ;;  %s1082_s9 = inlined_call_operand.vmem [shape: f32[1,5], index: 9, kind: input, shape index: {}]   ;;  %s1083_s10 = inlined_call_operand.vmem [shape: f32[24,2], index: 10, kind: output, shape index: {}]  }
   0x1   :  { %15 = sst [smem:[#allocation2]] %s1076_s3 }
   0x2 LB: > { %s734_s16 = sadd.s32 4294967295, %s863_s15   ;;  %p738_p0 = scmp.ge.s32.totalorder %s863_s15, 1  ;;  %s863_s15 = sphi %s926_s15, %s21_s15  }
   0x3   : > { %p321_p1 = scmp.lt.s32.totalorder %s863_s15, 4 }
   0x5   : > { %p322_p2 = pnand %p738_p0, %p321_p1 }
   0x6   : > { %p361_p3 = scmp.lt.s32.totalorder (!%p322_p2), %s734_s16, 2  ;;  %s867_s26 = smov (!%p322_p2), 125  }
   0x7   : > { %325 = sbr.rel (%p322_p2) target bundleno = 797 (0x31d), region = 60  ;;  %s658_s27 = sld [smem:[#allocation2]] (!%p322_p2) }
   0xc   : > { %v375_v0 = vld [vmem:[%s1077_s4 + $0x8] sm:$0xff]  ;;  %v865_v1 = vmov 0.0   ;;  %v374_v2 = vld [vmem:[%s1077_s4] sm:$0xff]  ;;  %vm866_vm0 = vmmov 0   ;;  %v473_v3 = vld [vmem:[%s1079_s6 + $0x78] sm:$0xff]  ;;  %s1085_s16 = smov (!%p361_p3, %s734_s16), 2 }
   0xd   : > { %779 = vmatprep.subr.mxu0 %v865_v1  ;;  %783 = vmatprep.mubr.msk.f32.mxu0 %vm866_vm0, %v865_v1  ;;  %v472_v4 = vld [vmem:[%s1079_s6 + $0x70] sm:$0xff]  ;;  %s951_s24 = sshll.u32 %s1085_s16, 3  ;;  %vm383_vm1 = vcmask 130048   ;;  %v471_v5 = vld [vmem:[%s1079_s6 + $0x68] sm:$0xff]  ;;  %v470_v7 = vld [vmem:[%s1079_s6 + $0x60] sm:$0xff]  ;;  %vm567_vm2 = vcmask 523264   ;;  %v659_v49 = vstv %s658_s27 }
   0xe   : > { %780 = vmatpush3.msra.mxu0 %v375_v0  ;;  %786 = vmatprep.subr.mxu1 %v865_v1  ;;  %s364_s29 = scalar_lea.vmem %s1073_s0, %s951_s24  ;;  %v469_v8 = vld [vmem:[%s1079_s6 + $0x58] sm:$0xff]  ;;  %v468_v9 = vld [vmem:[%s1079_s6 + $0x50] sm:$0xff]  ;;  %v467_v10 = vld [vmem:[%s1079_s6 + $0x48] sm:$0xff]  ;;  %s368_s22 = scalar_lea.vmem %s1074_s1, %s951_s24  ;;  %vm653_vm3 = vcmask 31744   ;;  %vm665_vm4 = vcmask 7168   ;;  %vm667_vm5 = vcmask 15360  }
   0xf   : > { %781 = vmatprep.subr.mxu0 %v865_v1  ;;  %787 = vmatpush3.msra.mxu1 %v473_v3  ;;  %v373_v6 = vld [vmem:[%s364_s29] sm:$0xff]  ;;  %v465_v12 = vld [vmem:[%s1079_s6 + $0x38] sm:$0xff]  ;;  %v464_v13 = vld [vmem:[%s1079_s6 + $0x30] sm:$0xff]  ;;  %s372_s30 = scalar_lea.vmem %s1083_s10, %s951_s24 }
  0x10   : > { %782 = vmatpush3.msra.mxu0 %v374_v2  ;;  %788 = vmatprep.subr.mxu1 %v865_v1  ;;  %v466_v11 = vld [vmem:[%s1079_s6 + $0x40] sm:$0xff]  ;;  %v463_v14 = vld [vmem:[%s1079_s6 + $0x28] sm:$0xff]  ;;  %v461_v16 = vld [vmem:[%s1079_s6 + $0x18] sm:$0xff] }
  0x11   : > { %789 = vmatpush3.msra.mxu1 %v472_v4  ;;  %818 = vmatprep.mubr.msk.f32.mxu1 %vm866_vm0, %v865_v1  ;;  %v462_v15 = vld [vmem:[%s1079_s6 + $0x20] sm:$0xff]  ;;  %v460_v17 = vld [vmem:[%s1079_s6 + $0x10] sm:$0xff]  ;;  %v459_v18 = vld [vmem:[%s1079_s6 + $0x8] sm:$0xff] }
  0x12   : > { %790 = vmatprep.subr.mxu1 %v865_v1  ;;  %821 = vmatprep.subr.mxu0 %v865_v1  ;;  %v458_v19 = vld [vmem:[%s1079_s6] sm:$0xff]  ;;  %v559_v25 = vld [vmem:[%s1081_s8 + $0x38] sm:$0xff]  ;;  %v558_v26 = vld [vmem:[%s1081_s8 + $0x30] sm:$0xff] }
  0x13   : > { %784 = vmatmul.mubr.msk.f32.vlgmr.msra.gmra.mxu0 %vm383_vm1, %v373_v6  ;;  %791 = vmatpush3.msra.mxu1 %v471_v5  ;;  %v742_v20 = vld [vmem:[%s1078_s5] ss:$0 sm:$0xff]  ;;  %v557_v27 = vld [vmem:[%s1081_s8 + $0x28] sm:$0xff]  ;;  %v555_v29 = vld [vmem:[%s1081_s8 + $0x18] sm:$0xff] }
  0x14   : > { %792 = vmatprep.subr.mxu1 %v865_v1  ;;  %837 = vmatprep.mubr.msk.f32.mxu0 %vm866_vm0, %v865_v1  ;;  %v556_v28 = vld [vmem:[%s1081_s8 + $0x20] sm:$0xff]  ;;  %v554_v30 = vld [vmem:[%s1081_s8 + $0x10] sm:$0xff]  ;;  %v553_v31 = vld [vmem:[%s1081_s8 + $0x8] sm:$0xff] }
  0x15   : > { %793 = vmatpush3.msra.mxu1 %v470_v7  ;;  %822 = vmatpush3.msra.mxu0 %v559_v25  ;;  %v552_v32 = vld [vmem:[%s1081_s8] sm:$0xff] }
  0x16   : > { %794 = vmatprep.subr.mxu1 %v865_v1  ;;  %823 = vmatprep.subr.mxu0 %v865_v1  ;;  %v744_v33 = vld [vmem:[%s1080_s7] ss:$0 sm:$0xff] }
  0x17   : > { %795 = vmatpush3.msra.mxu1 %v469_v8  ;;  %824 = vmatpush3.msra.mxu0 %v558_v26  ;;  %v745_v38 = vld [vmem:[%s1082_s9] ss:$0 sm:$0xff] }
  0x18   : > { %796 = vmatprep.subr.mxu1 %v865_v1  ;;  %825 = vmatprep.subr.mxu0 %v865_v1  ;;  %v642_v42 = vld [vmem:[%s368_s22] sm:$0xff] }
  0x19   : > { %797 = vmatpush3.msra.mxu1 %v468_v9  ;;  %826 = vmatpush3.msra.mxu0 %v557_v27  ;;  %v747_v45 = vld [vmem:[%s1075_s2] ss:$0 sm:$0xff] }
  0x1a   : > { %798 = vmatprep.subr.mxu1 %v865_v1  ;;  %827 = vmatprep.subr.mxu0 %v865_v1 }
  0x1b   : > { %799 = vmatpush3.msra.mxu1 %v467_v10  ;;  %828 = vmatpush3.msra.mxu0 %v556_v28 }
  0x1c   : > { %800 = vmatprep.subr.mxu1 %v865_v1  ;;  %829 = vmatprep.subr.mxu0 %v865_v1 }
  0x1d   : > { %801 = vmatpush3.msra.mxu1 %v466_v11  ;;  %830 = vmatpush3.msra.mxu0 %v555_v29 }
  0x1e   : > { %802 = vmatprep.subr.mxu1 %v865_v1  ;;  %831 = vmatprep.subr.mxu0 %v865_v1 }
  0x1f   : > { %803 = vmatpush3.msra.mxu1 %v465_v12  ;;  %832 = vmatpush3.msra.mxu0 %v554_v30 }
  0x20   : > { %804 = vmatprep.subr.mxu1 %v865_v1  ;;  %833 = vmatprep.subr.mxu0 %v865_v1 }
  0x21   : > { %805 = vmatpush3.msra.mxu1 %v464_v13  ;;  %834 = vmatpush3.msra.mxu0 %v553_v31 }
  0x22   : > { %806 = vmatprep.subr.mxu1 %v865_v1  ;;  %835 = vmatprep.subr.mxu0 %v865_v1 }
  0x23   : > { %807 = vmatpush3.msra.mxu1 %v463_v14  ;;  %836 = vmatpush3.msra.mxu0 %v552_v32 }
  0x24   : > { %808 = vmatprep.subr.mxu1 %v865_v1 }
  0x25   : > { %809 = vmatpush3.msra.mxu1 %v462_v15 }
  0x26   : > { %810 = vmatprep.subr.mxu1 %v865_v1 }
  0x27   : > { %811 = vmatpush3.msra.mxu1 %v461_v16 }
  0x28   : > { %812 = vmatprep.subr.mxu1 %v865_v1 }
  0x29   : > { %813 = vmatpush3.msra.mxu1 %v460_v17 }
  0x2a   : > { %814 = vmatprep.subr.mxu1 %v865_v1 }
  0x2b   : > { %815 = vmatpush3.msra.mxu1 %v459_v18 }
  0x2c   : > { %816 = vmatprep.subr.mxu1 %v865_v1 }
  0x2d   : > { %817 = vmatpush3.msra.mxu1 %v458_v19 }
  0xd3   : > { %v453_v21 = vpop.f32.mrf.mxu0 }
  0xd4   : > { %v454_v22 = vadd.f32 %v742_v20, %v453_v21 }
  0xd5   : > { %v785_v23 = vpop.f32.mrf.mxu0 }
  0xd6   : > { %851 = vtanh.f32 %v454_v22 }
  0xe3   : > { %v852_v24 = vpop.eup %851 }
  0xe4   : > { %819 = vmatmul.mubr.f32.vlgmr.msra.gmra.mxu1 %v852_v24 }
 0x1a4   : > { %v547_v34 = vpop.f32.mrf.mxu1 }
 0x1a5   : > { %v548_v35 = vadd.f32 %v744_v33, %v547_v34 }
 0x1a6   : > { %v820_v36 = vpop.f32.mrf.mxu1 }
 0x1a7   : > { %853 = vtanh.f32 %v548_v35 }
 0x1b4   : > { %v854_v37 = vpop.eup %853 }
 0x1b5   : > { %838 = vmatmul.mubr.msk.f32.vlgmr.msra.gmra.mxu0 %vm567_vm2, %v854_v37 }
 0x275   : > { %v637_v39 = vpop.f32.mrf.mxu0 }
 0x276   : > { %v638_v40 = vadd.f32 %v745_v38, %v637_v39 }
 0x277   : > { %v839_v41 = vpop.f32.mrf.mxu0 }
 0x278   : > { %855 = vtanh.f32 %v638_v40 }
 0x285   : > { %v856_v43 = vpop.eup %855 }
 0x286   : > { %v643_v44 = vsub.f32 %v642_v42, %v856_v43 }
 0x288   : > { %v644_v46 = vmul.f32 %v643_v44, %v643_v44 }
 0x28a   : > { %v652_v47 = vmul.f32 %v747_v45, %v644_v46 }
 0x28c   : > { %v654_v48 = vsel %vm653_vm3, %v652_v47, 0.0 }
 0x28d   : > { %655 = vadd.xlane.f32.xlu0 %v654_v48 }
 0x2a3   : > { %662 = vrot.lane.b32.xlu0 %v638_v40, %s867_s26 }
 0x316   : > { %v656_v50 = vpop.xlane.xlu0 %655 }
 0x317   : > { %v657_v51 = vmul.f32 -0.5, %v656_v50 }
 0x319   : > { %v660_v52 = vsub.f32 %v657_v51, %v659_v49 }
 0x31a   : > { %v663_v53 = vpop.permute.xlu0 %662 }
 0x31b   : > { %v666_v54 = vsel %vm665_vm4, %v660_v52, %v663_v53 }
 0x31c   : > { %668 = vst.msk [vmem:[%s372_s30] sm:$0xff] %vm667_vm5, %v666_v54 }
 0x31d PF: > { %s21_s15 = sadd.s32 1, %s863_s15  }
 0x31e   : > { %p18_p4 = scmp.ge.s32.totalorder %s21_s15, 5  }
 0x320   :  { %20 = sbr.rel (!%p18_p4) target bundleno = 2 (0x2), region = 93 }

</bundles_post_ra>
